<compile_context>
chip_gen: v7x
topology: tpu7x:2x2x1
jax: 0.10.0
libtpu: 0.0.40
codegen_flags: <defaults>
</compile_context>

<pallas_src>
import functools

import jax
import jax.numpy as jnp
from jax.experimental import pallas as pl
from jax.experimental.pallas import tpu as pltpu


def _round_up(x: int, m: int) -> int:
    return ((x + m - 1) // m) * m


def _vmem_bytes(tm: int, d0: int, d1p: int, d2: int) -> int:
    """VMEM model: double-buffered x/out tiles + single-copy weights/biases
    (Buffered(1)) + in-kernel f32 hidden and bf16 staging copies of x and h."""
    x_tile = tm * d0 * 4                      # f32 x tile
    out_tile = tm * d2 * 4                    # f32 out tile
    weights = (d0 * d1p + d1p * d2) * 2       # bf16 weights, single-buffered
    biases = (d1p + d2) * 4                   # f32 biases, single-buffered
    interm = tm * d1p * 4 + tm * d1p * 2 + tm * d0 * 2   # f32 h + bf16 h + bf16 x
    return 2 * (x_tile + out_tile) + weights + biases + interm


def _choose_tm(batch: int, tm_max: int, d0: int, d1p: int, d2: int,
               vmem_cap: int) -> int:
    """Batch tile: as large as possible (target tm_max, default 512), always a
    multiple of 8, bounded by the VMEM model, and split into >=2 grid steps for
    big batches so v7x's two TensorCores both get work."""
    tm_max = max(8, _round_up(tm_max, 8))     # guard non-multiple-of-8 callers
    bp8 = _round_up(batch, 8)
    if bp8 > tm_max:
        steps = pl.cdiv(bp8, tm_max)          # even split, minimal batch padding
        tm = _round_up(pl.cdiv(bp8, steps), 8)
    elif bp8 >= 512:
        tm = _round_up(pl.cdiv(bp8, 2), 8)    # fits one tile but big: 2 steps (v7x)
    else:
        tm = bp8                              # small batch: single step
    while tm > 8 and _vmem_bytes(tm, d0, d1p, d2) > vmem_cap:
        tm = _round_up(tm // 2, 8)
    return tm


def mlp_kernel(x_ref, w1_ref, b1_ref, w2_ref, b2_ref, o_ref):
    # x: (TM, d0) f32 | w1: (d0, d1p) bf16 | b1: (1, d1p) f32
    # w2: (d1p, d2) bf16 | b2: (1, d2) f32 | o: (TM, d2) f32
    x = x_ref[...].astype(jnp.bfloat16)       # in-kernel cast (free VPU slots)
    h = jnp.dot(x, w1_ref[...], preferred_element_type=jnp.float32)
    h = jnp.maximum(h + b1_ref[...], 0.0)     # f32 bias + ReLU epilogue
    out = jnp.dot(h.astype(jnp.bfloat16), w2_ref[...],
                  preferred_element_type=jnp.float32) + b2_ref[...]
    o_ref[...] = out.astype(o_ref.dtype)


@functools.partial(jax.jit, static_argnames=("tm",))
def simple_mlp_forward(x, w1, b1, w2, b2, *, tm=512):
    """x: (B, d0) f32; w1: (d0, d1); b1: (1, d1); w2: (d1, d2); b2: (1, d2)."""
    if x.ndim == 1:                           # mirror PyTorch forward's 1-D case
        x = x.reshape(x.shape[0], -1)
    B, d0 = x.shape
    d1 = w1.shape[1]
    d2 = w2.shape[1]

    # Hidden dim padded to 128 lanes (weights only -> no extra x/out HBM pass).
    d1p = _round_up(d1, 128)

    vmem_cap = 48 << 20                       # comfortably under v7x's 64 MiB
    TM = _choose_tm(B, tm, d0, d1p, d2, vmem_cap)
    Bp = _round_up(B, TM)

    # Fast path: skip the batch pad (an extra HBM pass over x) when aligned.
    xp = x if Bp == B else jnp.pad(x, ((0, Bp - B), (0, 0)))

    # Weights pre-cast once to bf16 (tiny, resident in VMEM across the grid).
    w1p = w1 if d1p == d1 else jnp.pad(w1, ((0, 0), (0, d1p - d1)))
    b1p = b1 if d1p == d1 else jnp.pad(b1, ((0, 0), (0, d1p - d1)))
    w2p = w2 if d1p == d1 else jnp.pad(w2, ((0, d1p - d1), (0, 0)))
    w1p = w1p.astype(jnp.bfloat16)
    w2p = w2p.astype(jnp.bfloat16)            # biases stay f32 for f32 epilogue

    grid = (Bp // TM,)
    vmem = pltpu.MemorySpace.VMEM
    resident = pl.Buffered(1)                 # constant blocks: single VMEM copy

    # Scheduling hint for XLA around the custom call.
    flops = 2 * Bp * (d0 * d1p + d1p * d2)
    bytes_accessed = (Bp * d0 * 4 + (d0 * d1p + d1p * d2) * 2
                      + (d1p + d2) * 4 + Bp * d2 * 4)
    cost = pl.CostEstimate(flops=flops, transcendentals=0,
                           bytes_accessed=bytes_accessed)

    vmem_limit = int(min(max(int(1.25 * _vmem_bytes(TM, d0, d1p, d2)) + (1 << 20),
                             16 << 20), vmem_cap))

    out = pl.pallas_call(
        mlp_kernel,
        out_shape=jax.ShapeDtypeStruct((Bp, d2), jnp.float32),
        grid=grid,
        in_specs=[
            pl.BlockSpec((TM, d0), lambda i: (i, 0), memory_space=vmem),
            pl.BlockSpec((d0, d1p), lambda i: (0, 0), memory_space=vmem,
                         pipeline_mode=resident),
            pl.BlockSpec((1, d1p), lambda i: (0, 0), memory_space=vmem,
                         pipeline_mode=resident),
            pl.BlockSpec((d1p, d2), lambda i: (0, 0), memory_space=vmem,
                         pipeline_mode=resident),
            pl.BlockSpec((1, d2), lambda i: (0, 0), memory_space=vmem,
                         pipeline_mode=resident),
        ],
        out_specs=pl.BlockSpec((TM, d2), lambda i: (i, 0), memory_space=vmem),
        compiler_params=pltpu.CompilerParams(
            dimension_semantics=("parallel",),   # shard batch tiles across TCs (v7x)
            vmem_limit_bytes=vmem_limit,
        ),
        cost_estimate=cost,
    )(xp, w1p, b1p, w2p, b2)

    # Fast path: no row slice (extra output pass) when the batch was aligned.
    return out if Bp == B else out[:B]


def init_linear_params(key, in_features, out_features):
    """Deterministic init matching nn.Linear's uniform(-1/sqrt(in), 1/sqrt(in)).
    Returns W of shape (in, out) and b of shape (1, out)."""
    kw, kb = jax.random.split(key)
    bound = 1.0 / jnp.sqrt(jnp.float32(in_features))
    w = jax.random.uniform(kw, (in_features, out_features), jnp.float32,
                           minval=-bound, maxval=bound)
    b = jax.random.uniform(kb, (1, out_features), jnp.float32,
                           minval=-bound, maxval=bound)
    return w, b


if __name__ == "__main__":
    dims = [32, 64, 16]       # dims[0] -> dims[1] -> dims[2]
    batch = 8

    key = jax.random.PRNGKey(0)
    kx, k1, k2 = jax.random.split(key, 3)

    x = jax.random.normal(kx, (batch, dims[0]), jnp.float32)
    w1, b1 = init_linear_params(k1, dims[0], dims[1])
    w2, b2 = init_linear_params(k2, dims[1], dims[2])

    out = simple_mlp_forward(x, w1, b1, w2, b2)
    out = jax.block_until_ready(out)

    # Reference in plain f32 JAX. Kernel uses bf16 MXU inputs (and a bf16
    # re-quantized hidden) with f32 accumulation -> bf16-appropriate tolerance.
    ref = jnp.maximum(x @ w1 + b1, 0.0) @ w2 + b2
    assert out.shape == (batch, dims[2])
    assert jnp.allclose(out, ref, atol=3e-2, rtol=3e-2), (
        f"max abs err = {jnp.max(jnp.abs(out - ref))}")

    print("KERNEL_OK")
</pallas_src>

<mosaic_0001>
module attributes {stable_mosaic.version = 11 : i64} {
  func.func @mlp_kernel(%arg0: i32, %arg1: memref<8x32xf32, #tpu.memory_space<vmem>>, %arg2: memref<32x128xbf16, #tpu.memory_space<vmem>>, %arg3: memref<1x128xf32, #tpu.memory_space<vmem>>, %arg4: memref<128x16xbf16, #tpu.memory_space<vmem>>, %arg5: memref<1x16xf32, #tpu.memory_space<vmem>>, %arg6: memref<8x16xf32, #tpu.memory_space<vmem>>) attributes {dimension_semantics = [#tpu.dimension_semantics<parallel>], iteration_bounds = array<i64: 1>, scalar_prefetch = 0 : i64, scratch_operands = 0 : i64, tpu.core_type = #tpu.core_type<tc>, window_params = [{transform_indices = @transform_0, window_bounds = array<i64: 8, 32>}, {pipeline_mode = #tpu.pipeline_mode<synchronous>, transform_indices = @transform_1, window_bounds = array<i64: 32, 128>}, {pipeline_mode = #tpu.pipeline_mode<synchronous>, transform_indices = @transform_2, window_bounds = array<i64: 1, 128>}, {pipeline_mode = #tpu.pipeline_mode<synchronous>, transform_indices = @transform_3, window_bounds = array<i64: 128, 16>}, {pipeline_mode = #tpu.pipeline_mode<synchronous>, transform_indices = @transform_4, window_bounds = array<i64: 1, 16>}, {transform_indices = @transform_5, window_bounds = array<i64: 8, 16>}]} {
    %c0 = arith.constant 0 : index
    %c0_0 = arith.constant 0 : index
    %0 = vector.load %arg1[%c0, %c0_0] : memref<8x32xf32, #tpu.memory_space<vmem>>, vector<8x32xf32>
    %1 = arith.truncf %0 : vector<8x32xf32> to vector<8x32xbf16>
    %c0_1 = arith.constant 0 : index
    %c0_2 = arith.constant 0 : index
    %2 = vector.load %arg2[%c0_1, %c0_2] : memref<32x128xbf16, #tpu.memory_space<vmem>>, vector<32x128xbf16>
    %cst = arith.constant dense<0.000000e+00> : vector<8x128xf32>
    %3 = tpu.matmul %1, %2, %cst {dimension_numbers = #tpu.dot_dimension_numbers<[1], [0], [0], [1], [0, 0, 1, 1], [], []>} : vector<8x32xbf16>, vector<32x128xbf16>, vector<8x128xf32> -> vector<8x128xf32>
    %c0_3 = arith.constant 0 : index
    %c0_4 = arith.constant 0 : index
    %4 = vector.load %arg3[%c0_3, %c0_4] : memref<1x128xf32, #tpu.memory_space<vmem>>, vector<1x128xf32>
    %5 = vector.broadcast %4 : vector<1x128xf32> to vector<8x128xf32>
    %6 = arith.addf %3, %5 : vector<8x128xf32>
    %cst_5 = arith.constant 0.000000e+00 : f32
    %7 = vector.broadcast %cst_5 : f32 to vector<8x128xf32>
    %8 = arith.maximumf %6, %7 : vector<8x128xf32>
    %9 = arith.truncf %8 : vector<8x128xf32> to vector<8x128xbf16>
    %c0_6 = arith.constant 0 : index
    %c0_7 = arith.constant 0 : index
    %10 = vector.load %arg4[%c0_6, %c0_7] : memref<128x16xbf16, #tpu.memory_space<vmem>>, vector<128x16xbf16>
    %cst_8 = arith.constant dense<0.000000e+00> : vector<8x16xf32>
    %11 = tpu.matmul %9, %10, %cst_8 {dimension_numbers = #tpu.dot_dimension_numbers<[1], [0], [0], [1], [0, 0, 1, 1], [], []>} : vector<8x128xbf16>, vector<128x16xbf16>, vector<8x16xf32> -> vector<8x16xf32>
    %c0_9 = arith.constant 0 : index
    %c0_10 = arith.constant 0 : index
    %12 = vector.load %arg5[%c0_9, %c0_10] : memref<1x16xf32, #tpu.memory_space<vmem>>, vector<1x16xf32>
    %13 = vector.broadcast %12 : vector<1x16xf32> to vector<8x16xf32>
    %14 = arith.addf %11, %13 : vector<8x16xf32>
    %c0_11 = arith.constant 0 : index
    %c0_12 = arith.constant 0 : index
    %15 = vector.load %arg6[%c0_11, %c0_12] : memref<8x16xf32, #tpu.memory_space<vmem>>, vector<8x16xf32>
    tpu.vector_store %arg6[%c0_11, %c0_12], %14 {strides = array<i32>} : memref<8x16xf32, #tpu.memory_space<vmem>>, vector<8x16xf32>,
    return
  }
  func.func @transform_0(%arg0: i32) -> (i32, i32) {
    %c0_i32 = arith.constant 0 : i32
    %c0_i32_0 = arith.constant 0 : i32
    return %arg0, %c0_i32 : i32, i32
  }
  func.func @transform_1(%arg0: i32) -> (i32, i32) {
    %c0_i32 = arith.constant 0 : i32
    %c0_i32_0 = arith.constant 0 : i32
    %c0_i32_1 = arith.constant 0 : i32
    return %c0_i32, %c0_i32_0 : i32, i32
  }
  func.func @transform_2(%arg0: i32) -> (i32, i32) {
    %c0_i32 = arith.constant 0 : i32
    %c0_i32_0 = arith.constant 0 : i32
    %c0_i32_1 = arith.constant 0 : i32
    return %c0_i32, %c0_i32_0 : i32, i32
  }
  func.func @transform_3(%arg0: i32) -> (i32, i32) {
    %c0_i32 = arith.constant 0 : i32
    %c0_i32_0 = arith.constant 0 : i32
    %c0_i32_1 = arith.constant 0 : i32
    return %c0_i32, %c0_i32_0 : i32, i32
  }
  func.func @transform_4(%arg0: i32) -> (i32, i32) {
    %c0_i32 = arith.constant 0 : i32
    %c0_i32_0 = arith.constant 0 : i32
    %c0_i32_1 = arith.constant 0 : i32
    return %c0_i32, %c0_i32_0 : i32, i32
  }
  func.func @transform_5(%arg0: i32) -> (i32, i32) {
    %c0_i32 = arith.constant 0 : i32
    %c0_i32_0 = arith.constant 0 : i32
    return %arg0, %c0_i32 : i32, i32
  }
}

</mosaic_0001>

<bundles_post_ra>
// kernel: simple_mlp_forward.1
= control target key start
LH: loop header
LB: loop body
LE: loop exit
PB: predicated region body
PF: predicated region fallthrough
CT: control target
= control target key end

     0   :  { %v310_v1 = vmov 0.0   ;;  %vm311_vm0 = vmmov 0   ;;  %vm47_vm1 = vcmask 261120   ;;  %s394_s0 = inlined_call_operand.vmem [shape: f32[8,32], index: 0, kind: input, shape index: {}]   ;;  %s395_s1 = inlined_call_operand.vmem [shape: bf16[32,128], index: 1, kind: input, shape index: {}]   ;;  %s396_s2 = inlined_call_operand.vmem [shape: f32[1,128], index: 2, kind: input, shape index: {}]   ;;  %s397_s3 = inlined_call_operand.vmem [shape: bf16[128,16], index: 3, kind: input, shape index: {}]   ;;  %s398_s4 = inlined_call_operand.vmem [shape: f32[1,16], index: 4, kind: input, shape index: {}]   ;;  %s399_s5 = inlined_call_operand.hbm [shape: f32[8,16], index: 5, kind: output, shape index: {}]  }
   0x1   :  { %v276_v0 = vld [vmem:[%s395_s1] sm:$0xff]   ;;  %245 = vmatprep.subr.bf16.mxu0 %v310_v1  ;;  %v277_v2 = vld [vmem:[%s395_s1 + $0x8] sm:$0xff]   ;;  %253 = vmatprep.subr.bf16.mxu1 %v310_v1  ;;  %v280_v7 = vld [vmem:[%s397_s3 + $0x10] sm:$0xff]  }
   0x2   :  { %246 = vmatpush3.bf16.msra.mxu0 %v276_v0  ;;  %249 = vmatprep.mubr.msk.bf16.mxu0 %vm311_vm0, %v310_v1  ;;  %v22_v3 = vld [vmem:[%s394_s0] sm:$0xff]  ;;  %v279_v6 = vld [vmem:[%s397_s3 + $0x8] sm:$0xff]  }
   0x3   :  { %247 = vmatprep.subr.bf16.mxu0 %v310_v1  ;;  %v278_v4 = vld [vmem:[%s397_s3] sm:$0xff]   ;;  %269 = vmatprep.mubr.msk.bf16.mxu1 %vm311_vm0, %v310_v1  ;;  %v23_v5 = vpack.c.bf16 %v22_v3, %v22_v3 }
   0x4   :  { %254 = vmatpush3.bf16.msra.mxu1 %v278_v4 }
   0x5   :  { %255 = vmatprep.subr.bf16.mxu1 %v310_v1 }
   0x6   :  { %248 = vmatpush3.bf16.msra.mxu0 %v277_v2 }
   0x8   :  { %256 = vmatpush3.bf16.msra.mxu1 %v279_v6 }
   0x9   :  { %250 = vmatmul.mubr.msk.bf16.vlgmr.msra.gmra.mrb[0].mxu0 %vm47_vm1, %v23_v5  ;;  %257 = vmatprep.subr.bf16.mxu1 %v310_v1 }
   0xa   :  { %10 = vsyncpa [#allocation3], 0  ;;  %v281_v8 = vld [vmem:[%s397_s3 + $0x18] sm:$0xff]   ;;  %v282_v9 = vld [vmem:[%s397_s3 + $0x20] sm:$0xff]   ;;  %s312_s17 = smov [#allocation2]   ;;  %vm204_vm2 = vcmask 130048  }
   0xb   :  { %v283_v10 = vld [vmem:[%s397_s3 + $0x28] sm:$0xff]   ;;  %v284_v11 = vld [vmem:[%s397_s3 + $0x30] sm:$0xff]   ;;  %v285_v12 = vld [vmem:[%s397_s3 + $0x38] sm:$0xff]   ;;  %s212_s18 = sshll.u32 %s312_s17, 4  ;;  %s213_s18 = int_to_ptr.vmem [resolvable:$true] %s212_s18 }
   0xc   :  { %258 = vmatpush3.bf16.msra.mxu1 %v280_v7  ;;  %v220_v13 = vld [vmem:[%s396_s2] ss:$0 sm:$0xff]  ;;  %s286_s2 = scalar_lea.vmem %s213_s18, 128  ;;  %p291_p1 = scmp.lt.s32.totalorder %s213_s18, %s213_s18 }
   0xd   :  { %259 = vmatprep.subr.bf16.mxu1 %v310_v1  ;;  %v224_v21 = vld [vmem:[%s398_s4] ss:$0 sm:$0xff]  ;;  %p287_p0 = scmp.ne.s32.totalorder %s213_s18, %s286_s2  ;;  %p292_p2 = scmp.lt.s32.totalorder %s286_s2, %s286_s2 }
   0xf   :  { %p293_p3 = por %p292_p2, %p291_p1 }
  0x10   :  { %260 = vmatpush3.bf16.msra.mxu1 %v281_v8 }
  0x11   :  { %261 = vmatprep.subr.bf16.mxu1 %v310_v1  ;;  %p294_p4 = pnand %p293_p3, %p287_p0 }
  0x14   :  { %262 = vmatpush3.bf16.msra.mxu1 %v282_v9 }
  0x15   :  { %263 = vmatprep.subr.bf16.mxu1 %v310_v1 }
  0x18   :  { %264 = vmatpush3.bf16.msra.mxu1 %v283_v10 }
  0x19   :  { %265 = vmatprep.subr.bf16.mxu1 %v310_v1 }
  0x1c   :  { %266 = vmatpush3.bf16.msra.mxu1 %v284_v11 }
  0x1d   :  { %267 = vmatprep.subr.bf16.mxu1 %v310_v1 }
  0x20   :  { %268 = vmatpush3.bf16.msra.mxu1 %v285_v12 }
  0xdc   :  { %v85_v14 = vpop.f32.mrb[0].mxu0 }
  0xdd   :  { %v86_v15 = vadd.f32 %v220_v13, %v85_v14  ;;  %v251_v16 = vpop.f32.mrb[1].mxu0 }
  0xde   :  { %v88_v17 = vpop.f32.mrb[2].mxu0 }
  0xdf   :  { %v91_v18 = vmax.f32 %v86_v15, 0.0  ;;  %v252_v19 = vpop.f32.mrb[3].mxu0 }
  0xe1   :  { %v92_v20 = vpack.c.bf16 %v91_v18, %v91_v18 }
  0xe3   :  { %270 = vmatmul.mubr.bf16.vlgmr.msra.gmra.mrb[0].mxu1 %v92_v20 }
 0x1b6   :  { %v198_v22 = vpop.f32.mrb[0].mxu1 }
 0x1b7   :  { %v199_v23 = vadd.f32 %v224_v21, %v198_v22  ;;  %v271_v24 = vpop.f32.mrb[1].mxu1 }
 0x1b8   :  { %v201_v25 = vpop.f32.mrb[2].mxu1 }
 0x1b9   :  { %v272_v26 = vpop.f32.mrb[3].mxu1  ;;  %205 = vst.msk [vmem:[#allocation2] sm:$0xff] %vm204_vm2, %v199_v23 }
 0x1ba   :  { %297 = shalt.err (!%p294_p4)
}
 0x1bb   :  { %s298_s4 = scalar_lea.hbm %s399_s5, 128 }
 0x1bc   :  { %p299_p5 = scmp.ne.s32.totalorder %s399_s5, %s298_s4  ;;  %p302_p6 = scmp.lt.u32.totalorder %s298_s4, %s399_s5 }
 0x1be   :  { %p304_p7 = pnand %p302_p6, %p299_p5 }
 0x1c0   :  { %307 = shalt.err (!%p304_p7)
}
 0x1c1   :  { %215 = dma.vmem_to_hbm [thread:$0]  %s213_s18, 128, %s399_s5, [#allocation3]  }
 0x1c2   :  { %308 = dma.done.wait [#allocation3], 128  }
 0x1c3   :  { %309 = vsyncadd [#allocation3], 4294967168 }
 0x1c4   :  { %219 = vsyncpa [#allocation3], 1 }

</bundles_post_ra>
